<compile_context>
chip_gen: v7x
topology: tpu7x:2x2x1
jax: 0.10.0
libtpu: 0.0.40
codegen_flags: <defaults>
</compile_context>

<pallas_src>
import functools
from typing import List, Optional, Sequence, Tuple

import jax
import jax.numpy as jnp
from jax.experimental import pallas as pl
from jax.experimental.pallas import tpu as pltpu


ROWS_PER_STEP = 8        # f32 sublane tile -> fully aligned (8, tb) output blocks
_LANE_TILE_CAP = 32768   # (8, 32768) f32 block = 1 MiB; ~3 MiB with double buffering


def _pick_lane_tile(B: int, cap: int = _LANE_TILE_CAP) -> int:
    """Largest lane tile (multiple of 128) that divides B, capped; else full B."""
    if B % 128 != 0 or B <= cap:
        return B  # full-dim block is always legal
    t = cap - (cap % 128)
    while t >= 128:
        if B % t == 0:
            return t
        t -= 128
    return 128


# ----------------------------------------------------------------------------
# Pallas kernel: grouped row gather.
#
#   grid = (n_groups, nb)   n_groups = K_pad // 8, nb = B // tb
#   idx_ref  : SMEM int32 [K_pad]   (scalar prefetch)
#   state    : HBM ref    [M, B]    (memory_space=pl.ANY, manual DMA)
#   out_ref  : VMEM block [8, tb]   (pipelined output block at (g, b))
#
# Each step issues 8 row DMAs straight into the output block, so HBM read
# traffic is exactly the gathered rows and every store is (8, 128)-aligned.
# ----------------------------------------------------------------------------
def _gather_rows_kernel(idx_ref, state_hbm, out_ref, sems, *, tb: int):
    g = pl.program_id(0)
    b = pl.program_id(1)
    col = b * tb
    if tb % 128 == 0:
        col = pl.multiple_of(col, 128)
    base = g * ROWS_PER_STEP

    copies = []
    for r in range(ROWS_PER_STEP):  # static unroll: 8 row DMAs in flight at once
        m = idx_ref[base + r]
        copies.append(
            pltpu.make_async_copy(
                state_hbm.at[pl.ds(m, 1), pl.ds(col, tb)],
                out_ref.at[pl.ds(r, 1), :],
                sems.at[r],
            )
        )
    for c in copies:
        c.start()
    for c in copies:
        c.wait()


def _gather_rows_padded(conc_mb: jax.Array, index_padded: jax.Array) -> jax.Array:
    """Core gather. index_padded must be int32, in-range, len % 8 == 0.

    Returns [K_pad, B]; rows beyond the caller's true K are padding (row 0).
    """
    M, B = conc_mb.shape
    K_pad = int(index_padded.shape[0])
    assert K_pad % ROWS_PER_STEP == 0 and K_pad > 0

    tb = _pick_lane_tile(B)
    nb = B // tb
    n_groups = K_pad // ROWS_PER_STEP

    itemsize = jnp.dtype(conc_mb.dtype).itemsize
    block_bytes = ROWS_PER_STEP * tb * itemsize
    # Honest limit: double-buffered output block + slack (review: ~2 MiB, not 32).
    vmem_bytes = max(2 * 1024 * 1024, 2 * block_bytes + (1 << 20))

    grid_spec = pltpu.PrefetchScalarGridSpec(
        num_scalar_prefetch=1,
        grid=(n_groups, nb),
        in_specs=[pl.BlockSpec(memory_space=pl.ANY)],   # state stays in HBM
        out_specs=pl.BlockSpec((ROWS_PER_STEP, tb), lambda g, b, idx: (g, b)),
        scratch_shapes=[pltpu.SemaphoreType.DMA((ROWS_PER_STEP,))],
    )

    return pl.pallas_call(
        functools.partial(_gather_rows_kernel, tb=tb),
        out_shape=jax.ShapeDtypeStruct((K_pad, B), conc_mb.dtype),
        grid_spec=grid_spec,
        compiler_params=pltpu.CompilerParams(
            # Row-group axis carries the real extent -> parallel (v7x 2 TCs).
            dimension_semantics=("parallel", "arbitrary"),
            vmem_limit_bytes=vmem_bytes,
        ),
    )(index_padded, conc_mb)


def _prep_index(index: jax.Array, M: int) -> Tuple[jax.Array, int]:
    """Cast to int32, pad to a multiple of 8 with row 0, clamp as a safety net."""
    idx = jnp.asarray(index, jnp.int32).reshape(-1)
    K = int(idx.shape[0])
    K_pad = -(-K // ROWS_PER_STEP) * ROWS_PER_STEP
    if K_pad != K:
        idx = jnp.concatenate([idx, jnp.zeros((K_pad - K,), jnp.int32)])
    # Safety net only: OOB HBM reads are unchecked.  Prefer host-side validation
    # (see ReactionNetwork) which raises instead of silently gathering row 0/M-1.
    idx = jnp.clip(idx, 0, M - 1)
    return idx, K


def gather_metabolites(conc_mb: jax.Array, index: jax.Array) -> jax.Array:
    """Convenience gather: conc_mb[index, :] for a metabolites-major [M, B] state."""
    idx, K = _prep_index(index, conc_mb.shape[0])
    return _gather_rows_padded(conc_mb, idx)[:K]


def _take_static_rows(arr: jax.Array, pos: Sequence[int]) -> jax.Array:
    """Pick rows at compile-time-known positions (static slices, no device gather)."""
    pos = list(pos)
    if not pos:
        return arr[0:0]
    if pos == list(range(pos[0], pos[0] + len(pos))):
        return arr[pos[0]: pos[0] + len(pos)]
    return jnp.concatenate([arr[p: p + 1] for p in pos], axis=0)


# ----------------------------------------------------------------------------
# Reaction: same wiring semantics as the PyTorch module (forward is abstract).
# ----------------------------------------------------------------------------
class Reaction:
    """Abstract reaction class that handles wiring of the reaction into a model."""

    def __init__(self, name: str, enzyme: str, substrates: Sequence[str], products: Sequence[str]):
        self.name = name
        self.enzyme = enzyme
        self.substrates = substrates
        self.products = products
        self.num_substrates = len(substrates)
        self.num_products = len(products)
        self._index: Optional[jax.Array] = None

    def get_substrate_index(self):
        if self._index is None:
            raise RuntimeError("Reaction index wasn't initialized. Add reaction to the model to fix.")
        return self.index[: self.num_substrates]

    def get_enzyme_index(self):
        if self._index is None:
            raise RuntimeError("Reaction index wasn't initialized. Add reaction to the model to fix.")
        return self.index[self.num_substrates: self.num_substrates + 1]

    def get_product_index(self):
        if self._index is None:
            raise RuntimeError("Reaction index wasn't initialized. Add reaction to the model to fix.")
        return self.index[self.num_substrates + 1:]

    @property
    def index(self):
        return self._index

    @index.setter
    def index(self, index: jax.Array):
        if self._index is not None:
            raise RuntimeError(
                'Metabolite index can be set only once when reaction is added to the model. '
                'Possibly cause: trying to add the same reaction to the model second time.'
            )
        self._index = index

    def split_gathered(self, gathered: jax.Array) -> Tuple[jax.Array, jax.Array, jax.Array]:
        """Split gathered rows (in this reaction's index order) into (S, E, P)."""
        ns, npr = self.num_substrates, self.num_products
        return (gathered[:ns],
                gathered[ns: ns + 1],
                gathered[ns + 1: ns + 1 + npr])

    def gather_inputs(self, concentrations_mb: jax.Array):
        """Gather this reaction's rows from the metabolites-major state [M, B]."""
        if self._index is None:
            raise RuntimeError("Reaction index wasn't initialized. Add reaction to the model to fix.")
        idx, _ = _prep_index(self._index, concentrations_mb.shape[0])
        gathered = _gather_rows_padded(concentrations_mb, idx)  # [K_pad, B]
        return self.split_gathered(gathered)

    def forward(self, substrate: jax.Array, enzyme: jax.Array):
        # Reference forward is abstract (`pass`) and returns None.
        # TODO(synk): concrete rate laws live in subclasses; they should fuse the
        # row gather into their own Pallas kernel via scalar-prefetched indices.
        return None

    __call__ = forward


class ReactionNetwork:
    """Host-side wiring for a set of reactions sharing one metabolite state.

    Builds the deduped, padded gather index ONCE at construction (host side,
    with host-side range validation), so the per-step device work is a single
    pallas_call over the unique metabolite rows.
    """

    def __init__(self, reactions: Sequence[Reaction], num_metabolites: int):
        self.reactions = list(reactions)
        self.num_metabolites = int(num_metabolites)

        unique: List[int] = []
        pos_of = {}
        self._positions: List[List[int]] = []
        for r in self.reactions:
            if r.index is None:
                raise RuntimeError("Reaction index wasn't initialized. Add reaction to the model to fix.")
            rows = [int(v) for v in jax.device_get(r.index)]
            pos = []
            for v in rows:
                if not (0 <= v < self.num_metabolites):
                    raise ValueError(
                        f"Reaction '{r.name}' has metabolite index {v} outside [0, {self.num_metabolites}).")
                if v not in pos_of:
                    pos_of[v] = len(unique)
                    unique.append(v)
                pos.append(pos_of[v])
            self._positions.append(pos)

        self.num_unique = len(unique)
        k_pad = max(ROWS_PER_STEP, -(-self.num_unique // ROWS_PER_STEP) * ROWS_PER_STEP)
        unique = unique + [0] * (k_pad - self.num_unique)
        self.unique_index = jnp.asarray(unique, jnp.int32)  # built once, reused every call

    def gather(self, concentrations_mb: jax.Array
               ) -> List[Tuple[jax.Array, jax.Array, jax.Array]]:
        """One pallas_call for the whole network; rows deduped across reactions."""
        gathered = _gather_rows_padded(concentrations_mb, self.unique_index)  # [K_pad, B]
        return [r.split_gathered(_take_static_rows(gathered, pos))
                for r, pos in zip(self.reactions, self._positions)]


if __name__ == "__main__":
    root = jax.random.PRNGKey(0)
    k_state, k_big, k_small = jax.random.split(root, 3)

    # Metabolites-major state [M, B]: metabolites on sublanes, batch on lanes.
    num_metabolites, batch = 16, 128
    concentrations_mb = jax.random.uniform(
        k_state, (num_metabolites, batch), jnp.float32, 0.1, 1.0)

    rxn1 = Reaction("hexokinase_rxn", "hexokinase",
                    substrates=["glucose", "atp"], products=["g6p", "adp"])
    rxn1.index = jnp.array([3, 0, 6, 2, 5], dtype=jnp.int32)

    rxn2 = Reaction("pgi_rxn", "pgi", substrates=["g6p"], products=["f6p"])
    rxn2.index = jnp.array([2, 9, 11], dtype=jnp.int32)

    # --- single-reaction gather (one pallas_call, one grid step) ---------------
    substrate, enzyme, products = rxn1.gather_inputs(concentrations_mb)
    jax.block_until_ready((substrate, enzyme, products))
    ref1 = concentrations_mb[rxn1.index, :]
    assert jnp.array_equal(substrate, ref1[:2])
    assert jnp.array_equal(enzyme, ref1[2:3])
    assert jnp.array_equal(products, ref1[3:5])

    # --- whole-network gather: deduped index built once, one pallas_call -------
    net = ReactionNetwork([rxn1, rxn2], num_metabolites)
    assert net.num_unique == 7  # g6p row (index 2) deduped across rxn1/rxn2
    per_rxn = net.gather(concentrations_mb)
    jax.block_until_ready(per_rxn)
    for rxn, (s, e, p) in zip([rxn1, rxn2], per_rxn):
        ref = concentrations_mb[rxn.index, :]
        assert jnp.array_equal(s, ref[: rxn.num_substrates])
        assert jnp.array_equal(e, ref[rxn.num_substrates: rxn.num_substrates + 1])
        assert jnp.array_equal(p, ref[rxn.num_substrates + 1:])

    # --- multi-group case: K=12 -> 2 row groups on the parallel grid axis ------
    conc_big = jax.random.uniform(k_big, (32, 256), jnp.float32, 0.1, 1.0)
    idx12 = jnp.array([5, 1, 31, 0, 7, 22, 13, 2, 2, 9, 30, 17], dtype=jnp.int32)
    g12 = gather_metabolites(conc_big, idx12)
    jax.block_until_ready(g12)
    assert jnp.array_equal(g12, conc_big[idx12, :])

    # --- tiny non-128-aligned batch (full-dim lane block) ----------------------
    conc_small = jax.random.uniform(k_small, (8, 2), jnp.float32, 0.1, 1.0)
    idx_small = jnp.array([7, 1, 4], dtype=jnp.int32)
    g_small = gather_metabolites(conc_small, idx_small)
    jax.block_until_ready(g_small)
    assert jnp.array_equal(g_small, conc_small[idx_small, :])

    # --- static index helpers / abstract forward -------------------------------
    assert jnp.array_equal(rxn1.get_substrate_index(), rxn1.index[:2])
    assert jnp.array_equal(rxn1.get_enzyme_index(), rxn1.index[2:3])
    assert jnp.array_equal(rxn1.get_product_index(), rxn1.index[3:])
    assert rxn1.forward(substrate, enzyme) is None  # abstract, like the reference

    print("KERNEL_OK")
</pallas_src>

<mosaic_0001>
module attributes {stable_mosaic.version = 11 : i64} {
  func.func @_gather_rows_kernel(%arg0: i32, %arg1: i32, %arg2: memref<8xi32, #tpu.memory_space<smem>>, %arg3: memref<16x128xf32, #tpu.memory_space<any>>, %arg4: memref<8x128xf32, #tpu.memory_space<vmem>>, %arg5: memref<8x!tpu.dma_semaphore, #tpu.memory_space<semaphore_mem>>) attributes {dimension_semantics = [#tpu.dimension_semantics<parallel>, #tpu.dimension_semantics<arbitrary>], iteration_bounds = array<i64: 1, 1>, scalar_prefetch = 1 : i64, scratch_operands = 1 : i64, tpu.core_type = #tpu.core_type<tc>, window_params = [{}, {transform_indices = @transform_1, window_bounds = array<i64: 8, 128>}]} {
    %c128_i32 = arith.constant 128 : i32
    %0 = arith.muli %arg1, %c128_i32 : i32
    %1 = tpu.assume_multiple %0, 128 : i32
    %c8_i32 = arith.constant 8 : i32
    %2 = arith.muli %arg0, %c8_i32 : i32
    %c0_i32 = arith.constant 0 : i32
    %3 = arith.addi %2, %c0_i32 : i32
    %4 = arith.index_cast %3 : i32 to index
    %5 = memref.load %arg2[%4] : memref<8xi32, #tpu.memory_space<smem>>
    %c1_i32 = arith.constant 1 : i32
    %6 = arith.addi %2, %c1_i32 : i32
    %7 = arith.index_cast %6 : i32 to index
    %8 = memref.load %arg2[%7] : memref<8xi32, #tpu.memory_space<smem>>
    %c2_i32 = arith.constant 2 : i32
    %9 = arith.addi %2, %c2_i32 : i32
    %10 = arith.index_cast %9 : i32 to index
    %11 = memref.load %arg2[%10] : memref<8xi32, #tpu.memory_space<smem>>
    %c3_i32 = arith.constant 3 : i32
    %12 = arith.addi %2, %c3_i32 : i32
    %13 = arith.index_cast %12 : i32 to index
    %14 = memref.load %arg2[%13] : memref<8xi32, #tpu.memory_space<smem>>
    %c4_i32 = arith.constant 4 : i32
    %15 = arith.addi %2, %c4_i32 : i32
    %16 = arith.index_cast %15 : i32 to index
    %17 = memref.load %arg2[%16] : memref<8xi32, #tpu.memory_space<smem>>
    %c5_i32 = arith.constant 5 : i32
    %18 = arith.addi %2, %c5_i32 : i32
    %19 = arith.index_cast %18 : i32 to index
    %20 = memref.load %arg2[%19] : memref<8xi32, #tpu.memory_space<smem>>
    %c6_i32 = arith.constant 6 : i32
    %21 = arith.addi %2, %c6_i32 : i32
    %22 = arith.index_cast %21 : i32 to index
    %23 = memref.load %arg2[%22] : memref<8xi32, #tpu.memory_space<smem>>
    %c7_i32 = arith.constant 7 : i32
    %24 = arith.addi %2, %c7_i32 : i32
    %25 = arith.index_cast %24 : i32 to index
    %26 = memref.load %arg2[%25] : memref<8xi32, #tpu.memory_space<smem>>
    %c0_i32_0 = arith.constant 0 : i32
    %27 = tpu.memref_slice %arg3[%5, %1] : memref<16x128xf32, #tpu.memory_space<any>> -> memref<1x128xf32, #tpu.memory_space<any>>
    %c0_i32_1 = arith.constant 0 : i32
    %c0_i32_2 = arith.constant 0 : i32
    %28 = tpu.memref_slice %arg4[%c0_i32_1, %c0_i32_2] : memref<8x128xf32, #tpu.memory_space<vmem>> -> memref<1x128xf32, #tpu.memory_space<vmem>>
    %29 = tpu.memref_slice %arg5[%c0_i32_0] : memref<8x!tpu.dma_semaphore, #tpu.memory_space<semaphore_mem>> -> memref<1x!tpu.dma_semaphore, #tpu.memory_space<semaphore_mem>>
    %30 = tpu.memref_squeeze %29 : memref<1x!tpu.dma_semaphore, #tpu.memory_space<semaphore_mem>> -> memref<!tpu.dma_semaphore, #tpu.memory_space<semaphore_mem>>
    tpu.enqueue_dma source(%27 : memref<1x128xf32, #tpu.memory_space<any>>) target(%28 : memref<1x128xf32, #tpu.memory_space<vmem>>) target_semaphore(%30 : memref<!tpu.dma_semaphore, #tpu.memory_space<semaphore_mem>>)
    %c1_i32_3 = arith.constant 1 : i32
    %31 = tpu.memref_slice %arg3[%8, %1] : memref<16x128xf32, #tpu.memory_space<any>> -> memref<1x128xf32, #tpu.memory_space<any>>
    %c1_i32_4 = arith.constant 1 : i32
    %c0_i32_5 = arith.constant 0 : i32
    %32 = tpu.memref_slice %arg4[%c1_i32_4, %c0_i32_5] : memref<8x128xf32, #tpu.memory_space<vmem>> -> memref<1x128xf32, #tpu.memory_space<vmem>>
    %33 = tpu.memref_slice %arg5[%c1_i32_3] : memref<8x!tpu.dma_semaphore, #tpu.memory_space<semaphore_mem>> -> memref<1x!tpu.dma_semaphore, #tpu.memory_space<semaphore_mem>>
    %34 = tpu.memref_squeeze %33 : memref<1x!tpu.dma_semaphore, #tpu.memory_space<semaphore_mem>> -> memref<!tpu.dma_semaphore, #tpu.memory_space<semaphore_mem>>
    tpu.enqueue_dma source(%31 : memref<1x128xf32, #tpu.memory_space<any>>) target(%32 : memref<1x128xf32, #tpu.memory_space<vmem>>) target_semaphore(%34 : memref<!tpu.dma_semaphore, #tpu.memory_space<semaphore_mem>>)
    %c2_i32_6 = arith.constant 2 : i32
    %35 = tpu.memref_slice %arg3[%11, %1] : memref<16x128xf32, #tpu.memory_space<any>> -> memref<1x128xf32, #tpu.memory_space<any>>
    %c2_i32_7 = arith.constant 2 : i32
    %c0_i32_8 = arith.constant 0 : i32
    %36 = tpu.memref_slice %arg4[%c2_i32_7, %c0_i32_8] : memref<8x128xf32, #tpu.memory_space<vmem>> -> memref<1x128xf32, #tpu.memory_space<vmem>>
    %37 = tpu.memref_slice %arg5[%c2_i32_6] : memref<8x!tpu.dma_semaphore, #tpu.memory_space<semaphore_mem>> -> memref<1x!tpu.dma_semaphore, #tpu.memory_space<semaphore_mem>>
    %38 = tpu.memref_squeeze %37 : memref<1x!tpu.dma_semaphore, #tpu.memory_space<semaphore_mem>> -> memref<!tpu.dma_semaphore, #tpu.memory_space<semaphore_mem>>
    tpu.enqueue_dma source(%35 : memref<1x128xf32, #tpu.memory_space<any>>) target(%36 : memref<1x128xf32, #tpu.memory_space<vmem>>) target_semaphore(%38 : memref<!tpu.dma_semaphore, #tpu.memory_space<semaphore_mem>>)
    %c3_i32_9 = arith.constant 3 : i32
    %39 = tpu.memref_slice %arg3[%14, %1] : memref<16x128xf32, #tpu.memory_space<any>> -> memref<1x128xf32, #tpu.memory_space<any>>
    %c3_i32_10 = arith.constant 3 : i32
    %c0_i32_11 = arith.constant 0 : i32
    %40 = tpu.memref_slice %arg4[%c3_i32_10, %c0_i32_11] : memref<8x128xf32, #tpu.memory_space<vmem>> -> memref<1x128xf32, #tpu.memory_space<vmem>>
    %41 = tpu.memref_slice %arg5[%c3_i32_9] : memref<8x!tpu.dma_semaphore, #tpu.memory_space<semaphore_mem>> -> memref<1x!tpu.dma_semaphore, #tpu.memory_space<semaphore_mem>>
    %42 = tpu.memref_squeeze %41 : memref<1x!tpu.dma_semaphore, #tpu.memory_space<semaphore_mem>> -> memref<!tpu.dma_semaphore, #tpu.memory_space<semaphore_mem>>
    tpu.enqueue_dma source(%39 : memref<1x128xf32, #tpu.memory_space<any>>) target(%40 : memref<1x128xf32, #tpu.memory_space<vmem>>) target_semaphore(%42 : memref<!tpu.dma_semaphore, #tpu.memory_space<semaphore_mem>>)
    %c4_i32_12 = arith.constant 4 : i32
    %43 = tpu.memref_slice %arg3[%17, %1] : memref<16x128xf32, #tpu.memory_space<any>> -> memref<1x128xf32, #tpu.memory_space<any>>
    %c4_i32_13 = arith.constant 4 : i32
    %c0_i32_14 = arith.constant 0 : i32
    %44 = tpu.memref_slice %arg4[%c4_i32_13, %c0_i32_14] : memref<8x128xf32, #tpu.memory_space<vmem>> -> memref<1x128xf32, #tpu.memory_space<vmem>>
    %45 = tpu.memref_slice %arg5[%c4_i32_12] : memref<8x!tpu.dma_semaphore, #tpu.memory_space<semaphore_mem>> -> memref<1x!tpu.dma_semaphore, #tpu.memory_space<semaphore_mem>>
    %46 = tpu.memref_squeeze %45 : memref<1x!tpu.dma_semaphore, #tpu.memory_space<semaphore_mem>> -> memref<!tpu.dma_semaphore, #tpu.memory_space<semaphore_mem>>
    tpu.enqueue_dma source(%43 : memref<1x128xf32, #tpu.memory_space<any>>) target(%44 : memref<1x128xf32, #tpu.memory_space<vmem>>) target_semaphore(%46 : memref<!tpu.dma_semaphore, #tpu.memory_space<semaphore_mem>>)
    %c5_i32_15 = arith.constant 5 : i32
    %47 = tpu.memref_slice %arg3[%20, %1] : memref<16x128xf32, #tpu.memory_space<any>> -> memref<1x128xf32, #tpu.memory_space<any>>
    %c5_i32_16 = arith.constant 5 : i32
    %c0_i32_17 = arith.constant 0 : i32
    %48 = tpu.memref_slice %arg4[%c5_i32_16, %c0_i32_17] : memref<8x128xf32, #tpu.memory_space<vmem>> -> memref<1x128xf32, #tpu.memory_space<vmem>>
    %49 = tpu.memref_slice %arg5[%c5_i32_15] : memref<8x!tpu.dma_semaphore, #tpu.memory_space<semaphore_mem>> -> memref<1x!tpu.dma_semaphore, #tpu.memory_space<semaphore_mem>>
    %50 = tpu.memref_squeeze %49 : memref<1x!tpu.dma_semaphore, #tpu.memory_space<semaphore_mem>> -> memref<!tpu.dma_semaphore, #tpu.memory_space<semaphore_mem>>
    tpu.enqueue_dma source(%47 : memref<1x128xf32, #tpu.memory_space<any>>) target(%48 : memref<1x128xf32, #tpu.memory_space<vmem>>) target_semaphore(%50 : memref<!tpu.dma_semaphore, #tpu.memory_space<semaphore_mem>>)
    %c6_i32_18 = arith.constant 6 : i32
    %51 = tpu.memref_slice %arg3[%23, %1] : memref<16x128xf32, #tpu.memory_space<any>> -> memref<1x128xf32, #tpu.memory_space<any>>
    %c6_i32_19 = arith.constant 6 : i32
    %c0_i32_20 = arith.constant 0 : i32
    %52 = tpu.memref_slice %arg4[%c6_i32_19, %c0_i32_20] : memref<8x128xf32, #tpu.memory_space<vmem>> -> memref<1x128xf32, #tpu.memory_space<vmem>>
    %53 = tpu.memref_slice %arg5[%c6_i32_18] : memref<8x!tpu.dma_semaphore, #tpu.memory_space<semaphore_mem>> -> memref<1x!tpu.dma_semaphore, #tpu.memory_space<semaphore_mem>>
    %54 = tpu.memref_squeeze %53 : memref<1x!tpu.dma_semaphore, #tpu.memory_space<semaphore_mem>> -> memref<!tpu.dma_semaphore, #tpu.memory_space<semaphore_mem>>
    tpu.enqueue_dma source(%51 : memref<1x128xf32, #tpu.memory_space<any>>) target(%52 : memref<1x128xf32, #tpu.memory_space<vmem>>) target_semaphore(%54 : memref<!tpu.dma_semaphore, #tpu.memory_space<semaphore_mem>>)
    %c7_i32_21 = arith.constant 7 : i32
    %55 = tpu.memref_slice %arg3[%26, %1] : memref<16x128xf32, #tpu.memory_space<any>> -> memref<1x128xf32, #tpu.memory_space<any>>
    %c7_i32_22 = arith.constant 7 : i32
    %c0_i32_23 = arith.constant 0 : i32
    %56 = tpu.memref_slice %arg4[%c7_i32_22, %c0_i32_23] : memref<8x128xf32, #tpu.memory_space<vmem>> -> memref<1x128xf32, #tpu.memory_space<vmem>>
    %57 = tpu.memref_slice %arg5[%c7_i32_21] : memref<8x!tpu.dma_semaphore, #tpu.memory_space<semaphore_mem>> -> memref<1x!tpu.dma_semaphore, #tpu.memory_space<semaphore_mem>>
    %58 = tpu.memref_squeeze %57 : memref<1x!tpu.dma_semaphore, #tpu.memory_space<semaphore_mem>> -> memref<!tpu.dma_semaphore, #tpu.memory_space<semaphore_mem>>
    tpu.enqueue_dma source(%55 : memref<1x128xf32, #tpu.memory_space<any>>) target(%56 : memref<1x128xf32, #tpu.memory_space<vmem>>) target_semaphore(%58 : memref<!tpu.dma_semaphore, #tpu.memory_space<semaphore_mem>>)
    %c0_i32_24 = arith.constant 0 : i32
    %59 = tpu.memref_slice %arg3[%5, %1] : memref<16x128xf32, #tpu.memory_space<any>> -> memref<1x128xf32, #tpu.memory_space<any>>
    %c0_i32_25 = arith.constant 0 : i32
    %c0_i32_26 = arith.constant 0 : i32
    %60 = tpu.memref_slice %arg4[%c0_i32_25, %c0_i32_26] : memref<8x128xf32, #tpu.memory_space<vmem>> -> memref<1x128xf32, #tpu.memory_space<vmem>>
    %61 = tpu.memref_slice %arg5[%c0_i32_24] : memref<8x!tpu.dma_semaphore, #tpu.memory_space<semaphore_mem>> -> memref<1x!tpu.dma_semaphore, #tpu.memory_space<semaphore_mem>>
    %62 = tpu.memref_squeeze %61 : memref<1x!tpu.dma_semaphore, #tpu.memory_space<semaphore_mem>> -> memref<!tpu.dma_semaphore, #tpu.memory_space<semaphore_mem>>
    tpu.wait_dma2 semaphore(%62 : memref<!tpu.dma_semaphore, #tpu.memory_space<semaphore_mem>>) src(%59 : memref<1x128xf32, #tpu.memory_space<any>>) dst(%60 : memref<1x128xf32, #tpu.memory_space<vmem>>)
    %c1_i32_27 = arith.constant 1 : i32
    %63 = tpu.memref_slice %arg3[%8, %1] : memref<16x128xf32, #tpu.memory_space<any>> -> memref<1x128xf32, #tpu.memory_space<any>>
    %c1_i32_28 = arith.constant 1 : i32
    %c0_i32_29 = arith.constant 0 : i32
    %64 = tpu.memref_slice %arg4[%c1_i32_28, %c0_i32_29] : memref<8x128xf32, #tpu.memory_space<vmem>> -> memref<1x128xf32, #tpu.memory_space<vmem>>
    %65 = tpu.memref_slice %arg5[%c1_i32_27] : memref<8x!tpu.dma_semaphore, #tpu.memory_space<semaphore_mem>> -> memref<1x!tpu.dma_semaphore, #tpu.memory_space<semaphore_mem>>
    %66 = tpu.memref_squeeze %65 : memref<1x!tpu.dma_semaphore, #tpu.memory_space<semaphore_mem>> -> memref<!tpu.dma_semaphore, #tpu.memory_space<semaphore_mem>>
    tpu.wait_dma2 semaphore(%66 : memref<!tpu.dma_semaphore, #tpu.memory_space<semaphore_mem>>) src(%63 : memref<1x128xf32, #tpu.memory_space<any>>) dst(%64 : memref<1x128xf32, #tpu.memory_space<vmem>>)
    %c2_i32_30 = arith.constant 2 : i32
    %67 = tpu.memref_slice %arg3[%11, %1] : memref<16x128xf32, #tpu.memory_space<any>> -> memref<1x128xf32, #tpu.memory_space<any>>
    %c2_i32_31 = arith.constant 2 : i32
    %c0_i32_32 = arith.constant 0 : i32
    %68 = tpu.memref_slice %arg4[%c2_i32_31, %c0_i32_32] : memref<8x128xf32, #tpu.memory_space<vmem>> -> memref<1x128xf32, #tpu.memory_space<vmem>>
    %69 = tpu.memref_slice %arg5[%c2_i32_30] : memref<8x!tpu.dma_semaphore, #tpu.memory_space<semaphore_mem>> -> memref<1x!tpu.dma_semaphore, #tpu.memory_space<semaphore_mem>>
    %70 = tpu.memref_squeeze %69 : memref<1x!tpu.dma_semaphore, #tpu.memory_space<semaphore_mem>> -> memref<!tpu.dma_semaphore, #tpu.memory_space<semaphore_mem>>
    tpu.wait_dma2 semaphore(%70 : memref<!tpu.dma_semaphore, #tpu.memory_space<semaphore_mem>>) src(%67 : memref<1x128xf32, #tpu.memory_space<any>>) dst(%68 : memref<1x128xf32, #tpu.memory_space<vmem>>)
    %c3_i32_33 = arith.constant 3 : i32
    %71 = tpu.memref_slice %arg3[%14, %1] : memref<16x128xf32, #tpu.memory_space<any>> -> memref<1x128xf32, #tpu.memory_space<any>>
    %c3_i32_34 = arith.constant 3 : i32
    %c0_i32_35 = arith.constant 0 : i32
    %72 = tpu.memref_slice %arg4[%c3_i32_34, %c0_i32_35] : memref<8x128xf32, #tpu.memory_space<vmem>> -> memref<1x128xf32, #tpu.memory_space<vmem>>
    %73 = tpu.memref_slice %arg5[%c3_i32_33] : memref<8x!tpu.dma_semaphore, #tpu.memory_space<semaphore_mem>> -> memref<1x!tpu.dma_semaphore, #tpu.memory_space<semaphore_mem>>
    %74 = tpu.memref_squeeze %73 : memref<1x!tpu.dma_semaphore, #tpu.memory_space<semaphore_mem>> -> memref<!tpu.dma_semaphore, #tpu.memory_space<semaphore_mem>>
    tpu.wait_dma2 semaphore(%74 : memref<!tpu.dma_semaphore, #tpu.memory_space<semaphore_mem>>) src(%71 : memref<1x128xf32, #tpu.memory_space<any>>) dst(%72 : memref<1x128xf32, #tpu.memory_space<vmem>>)
    %c4_i32_36 = arith.constant 4 : i32
    %75 = tpu.memref_slice %arg3[%17, %1] : memref<16x128xf32, #tpu.memory_space<any>> -> memref<1x128xf32, #tpu.memory_space<any>>
    %c4_i32_37 = arith.constant 4 : i32
    %c0_i32_38 = arith.constant 0 : i32
    %76 = tpu.memref_slice %arg4[%c4_i32_37, %c0_i32_38] : memref<8x128xf32, #tpu.memory_space<vmem>> -> memref<1x128xf32, #tpu.memory_space<vmem>>
    %77 = tpu.memref_slice %arg5[%c4_i32_36] : memref<8x!tpu.dma_semaphore, #tpu.memory_space<semaphore_mem>> -> memref<1x!tpu.dma_semaphore, #tpu.memory_space<semaphore_mem>>
    %78 = tpu.memref_squeeze %77 : memref<1x!tpu.dma_semaphore, #tpu.memory_space<semaphore_mem>> -> memref<!tpu.dma_semaphore, #tpu.memory_space<semaphore_mem>>
    tpu.wait_dma2 semaphore(%78 : memref<!tpu.dma_semaphore, #tpu.memory_space<semaphore_mem>>) src(%75 : memref<1x128xf32, #tpu.memory_space<any>>) dst(%76 : memref<1x128xf32, #tpu.memory_space<vmem>>)
    %c5_i32_39 = arith.constant 5 : i32
    %79 = tpu.memref_slice %arg3[%20, %1] : memref<16x128xf32, #tpu.memory_space<any>> -> memref<1x128xf32, #tpu.memory_space<any>>
    %c5_i32_40 = arith.constant 5 : i32
    %c0_i32_41 = arith.constant 0 : i32
    %80 = tpu.memref_slice %arg4[%c5_i32_40, %c0_i32_41] : memref<8x128xf32, #tpu.memory_space<vmem>> -> memref<1x128xf32, #tpu.memory_space<vmem>>
    %81 = tpu.memref_slice %arg5[%c5_i32_39] : memref<8x!tpu.dma_semaphore, #tpu.memory_space<semaphore_mem>> -> memref<1x!tpu.dma_semaphore, #tpu.memory_space<semaphore_mem>>
    %82 = tpu.memref_squeeze %81 : memref<1x!tpu.dma_semaphore, #tpu.memory_space<semaphore_mem>> -> memref<!tpu.dma_semaphore, #tpu.memory_space<semaphore_mem>>
    tpu.wait_dma2 semaphore(%82 : memref<!tpu.dma_semaphore, #tpu.memory_space<semaphore_mem>>) src(%79 : memref<1x128xf32, #tpu.memory_space<any>>) dst(%80 : memref<1x128xf32, #tpu.memory_space<vmem>>)
    %c6_i32_42 = arith.constant 6 : i32
    %83 = tpu.memref_slice %arg3[%23, %1] : memref<16x128xf32, #tpu.memory_space<any>> -> memref<1x128xf32, #tpu.memory_space<any>>
    %c6_i32_43 = arith.constant 6 : i32
    %c0_i32_44 = arith.constant 0 : i32
    %84 = tpu.memref_slice %arg4[%c6_i32_43, %c0_i32_44] : memref<8x128xf32, #tpu.memory_space<vmem>> -> memref<1x128xf32, #tpu.memory_space<vmem>>
    %85 = tpu.memref_slice %arg5[%c6_i32_42] : memref<8x!tpu.dma_semaphore, #tpu.memory_space<semaphore_mem>> -> memref<1x!tpu.dma_semaphore, #tpu.memory_space<semaphore_mem>>
    %86 = tpu.memref_squeeze %85 : memref<1x!tpu.dma_semaphore, #tpu.memory_space<semaphore_mem>> -> memref<!tpu.dma_semaphore, #tpu.memory_space<semaphore_mem>>
    tpu.wait_dma2 semaphore(%86 : memref<!tpu.dma_semaphore, #tpu.memory_space<semaphore_mem>>) src(%83 : memref<1x128xf32, #tpu.memory_space<any>>) dst(%84 : memref<1x128xf32, #tpu.memory_space<vmem>>)
    %c7_i32_45 = arith.constant 7 : i32
    %87 = tpu.memref_slice %arg3[%26, %1] : memref<16x128xf32, #tpu.memory_space<any>> -> memref<1x128xf32, #tpu.memory_space<any>>
    %c7_i32_46 = arith.constant 7 : i32
    %c0_i32_47 = arith.constant 0 : i32
    %88 = tpu.memref_slice %arg4[%c7_i32_46, %c0_i32_47] : memref<8x128xf32, #tpu.memory_space<vmem>> -> memref<1x128xf32, #tpu.memory_space<vmem>>
    %89 = tpu.memref_slice %arg5[%c7_i32_45] : memref<8x!tpu.dma_semaphore, #tpu.memory_space<semaphore_mem>> -> memref<1x!tpu.dma_semaphore, #tpu.memory_space<semaphore_mem>>
    %90 = tpu.memref_squeeze %89 : memref<1x!tpu.dma_semaphore, #tpu.memory_space<semaphore_mem>> -> memref<!tpu.dma_semaphore, #tpu.memory_space<semaphore_mem>>
    tpu.wait_dma2 semaphore(%90 : memref<!tpu.dma_semaphore, #tpu.memory_space<semaphore_mem>>) src(%87 : memref<1x128xf32, #tpu.memory_space<any>>) dst(%88 : memref<1x128xf32, #tpu.memory_space<vmem>>)
    return
  }
  func.func @transform_1(%arg0: i32, %arg1: i32, %arg2: memref<8xi32, #tpu.memory_space<smem>>) -> (i32, i32) {
    %c0_i32 = arith.constant 0 : i32
    return %arg0, %arg1 : i32, i32
  }
}

</mosaic_0001>

<bundles_post_ra>
// kernel: tpu_custom_call.1
= control target key start
LH: loop header
LB: loop body
LE: loop exit
PB: predicated region body
PF: predicated region fallthrough
CT: control target
= control target key end

     0   :  { %s730_s0 = inlined_call_operand.hbm [shape: s32[8], index: 0, kind: input, shape index: {}]   ;;  %s731_s1 = inlined_call_operand.hbm [shape: f32[16,128], index: 1, kind: input, shape index: {}]   ;;  %s732_s2 = inlined_call_operand.hbm [shape: f32[8,128], index: 2, kind: output, shape index: {}]  }
   0x1   :  { %s299_s11 = scalar_lea.hbm %s730_s0, 16 }
   0x2   :  { %p300_p0 = scmp.ne.s32.totalorder %s730_s0, %s299_s11  ;;  %p303_p1 = scmp.lt.u32.totalorder %s299_s11, %s730_s0 }
   0x4   :  { %p305_p2 = pnand %p303_p1, %p300_p0 }
   0x6   :  { %308 = shalt.err (!%p305_p2)  }
   0x7   :  { %s543_s16 = smov [#allocation4]  }
   0x8   :  { %8 = dma.hbm_to_smem %s730_s0, 16, %s543_s16, [#allocation3] }
   0x9   :  { %523 = dma.done.wait [#allocation3], 16 }
   0xa   :  { %524 = vsyncadd [#allocation3], 4294967280 }
   0xb   :  { %10 = sfence }
   0xc   :  { %11 = vsyncpa [#allocation6], 0  ;;  %s14_s19 = sld [smem:[#allocation4]]  ;;  %s544_s20 = smov [#allocation5]  }
   0xd   :  { %s41_s21 = sshll.u32 %s544_s20, 4  ;;  %s579_s22 = sld [smem:[#allocation4 + $0x1]]  ;;  %s581_s21 = int_to_ptr.vmem [resolvable:$true] %s41_s21 }
   0xe   :  { %s545_s23 = smov [#allocation5 + $0x1]   ;;  %s583_s25 = sld [smem:[#allocation4 + $0x2]] }
   0xf   :  { %s57_s24 = sshll.u32 %s545_s23, 4  ;;  %s546_s26 = smov [#allocation5 + $0x2]   ;;  %s585_s24 = int_to_ptr.vmem [resolvable:$true] %s57_s24 }
  0x10   :  { %s73_s0 = sshll.u32 %s546_s26, 4  ;;  %s587_s27 = sld [smem:[#allocation4 + $0x3]]  ;;  %s589_s0 = int_to_ptr.vmem [resolvable:$true] %s73_s0 }
  0x11   :  { %s598_s8 = scalar_lea.hbm %s731_s1, 256 }
  0x12   :  { %s274_s28 = sshll.u32 %s14_s19, 4 }
  0x13   :  { %s33_s3 = scalar_lea.hbm %s731_s1, %s274_s28  ;;  %s275_s4 = sshll.u32 %s579_s22, 4 }
  0x14   :  { %s309_s5 = scalar_lea.hbm %s33_s3, 16  ;;  %p312_p4 = scmp.lt.u32.totalorder %s33_s3, %s731_s1 }
  0x15   :  { %p310_p3 = scmp.ne.s32.totalorder %s33_s3, %s309_s5  ;;  %p313_p5 = scmp.lt.u32.totalorder %s598_s8, %s309_s5 }
  0x16   :  { %p315_p7 = scmp.lt.u32.totalorder %s309_s5, %s33_s3 }
  0x17   :  { %p314_p6 = por %p313_p5, %p312_p4 }
  0x19   :  { %p316_p8 = por %p315_p7, %p314_p6 }
  0x1b   :  { %p317_p9 = pnand %p316_p8, %p310_p3 }
  0x1d   :  { %320 = shalt.err (!%p317_p9)  }
  0x1e   :  { %s321_s11 = scalar_lea.vmem %s581_s21, 16  ;;  %s607_s12 = scalar_lea.vmem %s581_s21, 128 }
  0x1f   :  { %p322_p10 = scmp.ne.s32.totalorder %s581_s21, %s321_s11  ;;  %p326_p11 = scmp.lt.s32.totalorder %s581_s21, %s581_s21 }
  0x20   :  { %p327_p12 = scmp.lt.s32.totalorder %s607_s12, %s321_s11 }
  0x22   :  { %p328_p13 = por %p327_p12, %p326_p11 }
  0x24   :  { %p329_p0 = pnand %p328_p13, %p322_p10 }
  0x26   :  { %332 = shalt.err (!%p329_p0)  }
  0x27   :  { %44 = dma.hbm_to_vmem [thread:$0]  %s33_s3, 16, %s581_s21, [#allocation2] }
  0x28   :  { %s47_s15 = scalar_lea.hbm %s731_s1, %s275_s4  ;;  %s276_s16 = sshll.u32 %s583_s25, 4 }
  0x29   :  { %s333_s17 = scalar_lea.hbm %s47_s15, 16  ;;  %p336_p2 = scmp.lt.u32.totalorder %s47_s15, %s731_s1 }
  0x2a   :  { %p334_p1 = scmp.ne.s32.totalorder %s47_s15, %s333_s17  ;;  %p337_p3 = scmp.lt.u32.totalorder %s598_s8, %s333_s17 }
  0x2b   :  { %p339_p5 = scmp.lt.u32.totalorder %s333_s17, %s47_s15 }
  0x2c   :  { %p338_p4 = por %p337_p3, %p336_p2 }
  0x2e   :  { %p340_p6 = por %p339_p5, %p338_p4 }
  0x30   :  { %p341_p7 = pnand %p340_p6, %p334_p1 }
  0x32   :  { %344 = shalt.err (!%p341_p7)  }
  0x33   :  { %s345_s20 = scalar_lea.vmem %s585_s24, 16  ;;  %p350_p9 = scmp.lt.s32.totalorder %s585_s24, %s581_s21 }
  0x34   :  { %p346_p8 = scmp.ne.s32.totalorder %s585_s24, %s345_s20  ;;  %p351_p10 = scmp.lt.s32.totalorder %s607_s12, %s345_s20 }
  0x36   :  { %p352_p12 = por %p351_p10, %p350_p9 }
  0x38   :  { %p353_p13 = pnand %p352_p12, %p346_p8 }
  0x3a   :  { %356 = shalt.err (!%p353_p13)  }
  0x3b   :  { %60 = dma.hbm_to_vmem [thread:$0]  %s47_s15, 16, %s585_s24, [#allocation2 + $0x1] }
  0x3c   :  { %s63_s25 = scalar_lea.hbm %s731_s1, %s276_s16  ;;  %s277_s26 = sshll.u32 %s587_s27, 4 }
  0x3d   :  { %s357_s28 = scalar_lea.hbm %s63_s25, 16  ;;  %p360_p1 = scmp.lt.u32.totalorder %s63_s25, %s731_s1 }
  0x3e   :  { %p358_p0 = scmp.ne.s32.totalorder %s63_s25, %s357_s28  ;;  %p361_p2 = scmp.lt.u32.totalorder %s598_s8, %s357_s28 }
  0x3f   :  { %p363_p4 = scmp.lt.u32.totalorder %s357_s28, %s63_s25 }
  0x40   :  { %p362_p3 = por %p361_p2, %p360_p1 }
  0x42   :  { %p364_p5 = por %p363_p4, %p362_p3 }
  0x44   :  { %p365_p6 = pnand %p364_p5, %p358_p0 }
  0x46   :  { %368 = shalt.err (!%p365_p6)  }
  0x47   :  { %s369_s24 = scalar_lea.vmem %s589_s0, 16  ;;  %p374_p8 = scmp.lt.s32.totalorder %s589_s0, %s581_s21 }
  0x48   :  { %p370_p7 = scmp.ne.s32.totalorder %s589_s0, %s369_s24  ;;  %p375_p9 = scmp.lt.s32.totalorder %s607_s12, %s369_s24 }
  0x4a   :  { %p376_p10 = por %p375_p9, %p374_p8 }
  0x4c   :  { %p377_p12 = pnand %p376_p10, %p370_p7 }
  0x4e   :  { %380 = shalt.err (!%p377_p12)  }
  0x4f   :  { %76 = dma.hbm_to_vmem [thread:$0]  %s63_s25, 16, %s589_s0, [#allocation2 + $0x2] }
  0x50   :  { %s79_s4 = scalar_lea.hbm %s731_s1, %s277_s26  ;;  %s547_s5 = smov [#allocation5 + $0x3]  }
  0x51   :  { %s89_s6 = sshll.u32 %s547_s5, 4  ;;  %s647_s7 = sld [smem:[#allocation4 + $0x4]]  ;;  %s90_s6 = int_to_ptr.vmem [resolvable:$true] %s89_s6 }
  0x52   :  { %s381_s9 = scalar_lea.hbm %s79_s4, 16  ;;  %p384_p0 = scmp.lt.u32.totalorder %s79_s4, %s731_s1 }
  0x53   :  { %p382_p13 = scmp.ne.s32.totalorder %s79_s4, %s381_s9  ;;  %p385_p1 = scmp.lt.u32.totalorder %s598_s8, %s381_s9 }
  0x54   :  { %p387_p3 = scmp.lt.u32.totalorder %s381_s9, %s79_s4 }
  0x55   :  { %p386_p2 = por %p385_p1, %p384_p0 }
  0x57   :  { %p388_p4 = por %p387_p3, %p386_p2 }
  0x59   :  { %p389_p5 = pnand %p388_p4, %p382_p13 }
  0x5b   :  { %392 = shalt.err (!%p389_p5)  }
  0x5c   :  { %s393_s0 = scalar_lea.vmem %s90_s6, 16  ;;  %p398_p7 = scmp.lt.s32.totalorder %s90_s6, %s581_s21 }
  0x5d   :  { %p394_p6 = scmp.ne.s32.totalorder %s90_s6, %s393_s0  ;;  %p399_p8 = scmp.lt.s32.totalorder %s607_s12, %s393_s0 }
  0x5f   :  { %p400_p9 = por %p399_p8, %p398_p7 }
  0x61   :  { %p401_p10 = pnand %p400_p9, %p394_p6 }
  0x63   :  { %404 = shalt.err (!%p401_p10)  }
  0x64   :  { %92 = dma.hbm_to_vmem [thread:$0]  %s79_s4, 16, %s90_s6, [#allocation2 + $0x3] }
  0x65   :  { %s548_s13 = smov [#allocation5 + $0x4]   ;;  %s655_s15 = sld [smem:[#allocation4 + $0x5]] }
  0x66   :  { %s105_s14 = sshll.u32 %s548_s13, 4  ;;  %s549_s16 = smov [#allocation5 + $0x5]   ;;  %s106_s14 = int_to_ptr.vmem [resolvable:$true] %s105_s14 }
  0x67   :  { %s121_s17 = sshll.u32 %s549_s16, 4  ;;  %s657_s18 = sld [smem:[#allocation4 + $0x6]]  ;;  %s660_s17 = int_to_ptr.vmem [resolvable:$true] %s121_s17 }
  0x68   :  { %s278_s19 = sshll.u32 %s647_s7, 4 }
  0x69   :  { %s95_s23 = scalar_lea.hbm %s731_s1, %s278_s19 }
  0x6a   :  { %s405_s25 = scalar_lea.hbm %s95_s23, 16  ;;  %p408_p13 = scmp.lt.u32.totalorder %s95_s23, %s731_s1 }
  0x6b   :  { %p406_p12 = scmp.ne.s32.totalorder %s95_s23, %s405_s25  ;;  %p409_p0 = scmp.lt.u32.totalorder %s598_s8, %s405_s25 }
  0x6c   :  { %p411_p2 = scmp.lt.u32.totalorder %s405_s25, %s95_s23 }
  0x6d   :  { %p410_p1 = por %p409_p0, %p408_p13 }
  0x6f   :  { %p412_p3 = por %p411_p2, %p410_p1 }
  0x71   :  { %p413_p4 = pnand %p412_p3, %p406_p12 }
  0x73   :  { %416 = shalt.err (!%p413_p4)  }
  0x74   :  { %s417_s29 = scalar_lea.vmem %s106_s14, 16  ;;  %p422_p6 = scmp.lt.s32.totalorder %s106_s14, %s581_s21 }
  0x75   :  { %p418_p5 = scmp.ne.s32.totalorder %s106_s14, %s417_s29  ;;  %p423_p7 = scmp.lt.s32.totalorder %s607_s12, %s417_s29 }
  0x77   :  { %p424_p8 = por %p423_p7, %p422_p6 }
  0x79   :  { %p425_p9 = pnand %p424_p8, %p418_p5 }
  0x7b   :  { %428 = shalt.err (!%p425_p9)  }
  0x7c   :  { %108 = dma.hbm_to_vmem [thread:$0]  %s95_s23, 16, %s106_s14, [#allocation2 + $0x4] }
  0x7d   :  { %s279_s30 = sshll.u32 %s655_s15, 4  ;;  %s550_s24 = smov [#allocation5 + $0x6]  }
  0x7e   :  { %s137_s27 = sshll.u32 %s550_s24, 4  ;;  %s111_s5 = scalar_lea.hbm %s731_s1, %s279_s30  ;;  %s675_s27 = int_to_ptr.vmem [resolvable:$true] %s137_s27 }
  0x7f   :  { %s429_s6 = scalar_lea.hbm %s111_s5, 16  ;;  %p432_p12 = scmp.lt.u32.totalorder %s111_s5, %s731_s1 }
  0x80   :  { %p430_p10 = scmp.ne.s32.totalorder %s111_s5, %s429_s6  ;;  %p433_p13 = scmp.lt.u32.totalorder %s598_s8, %s429_s6 }
  0x81   :  { %p435_p1 = scmp.lt.u32.totalorder %s429_s6, %s111_s5 }
  0x82   :  { %p434_p0 = por %p433_p13, %p432_p12 }
  0x84   :  { %p436_p2 = por %p435_p1, %p434_p0 }
  0x86   :  { %p437_p3 = pnand %p436_p2, %p430_p10 }
  0x88   :  { %440 = shalt.err (!%p437_p3)  }
  0x89   :  { %s441_s10 = scalar_lea.vmem %s660_s17, 16  ;;  %p446_p5 = scmp.lt.s32.totalorder %s660_s17, %s581_s21 }
  0x8a   :  { %p442_p4 = scmp.ne.s32.totalorder %s660_s17, %s441_s10  ;;  %p447_p6 = scmp.lt.s32.totalorder %s607_s12, %s441_s10 }
  0x8c   :  { %p448_p7 = por %p447_p6, %p446_p5 }
  0x8e   :  { %p449_p8 = pnand %p448_p7, %p442_p4 }
  0x90   :  { %452 = shalt.err (!%p449_p8)  }
  0x91   :  { %124 = dma.hbm_to_vmem [thread:$0]  %s111_s5, 16, %s660_s17, [#allocation2 + $0x5] }
  0x92   :  { %s280_s11 = sshll.u32 %s657_s18, 4  ;;  %s273_s0 = sld [smem:[#allocation4 + $0x7]] }
  0x93   :  { %s127_s15 = scalar_lea.hbm %s731_s1, %s280_s11 }
  0x94   :  { %s453_s16 = scalar_lea.hbm %s127_s15, 16  ;;  %p456_p10 = scmp.lt.u32.totalorder %s127_s15, %s731_s1 }
  0x95   :  { %p454_p9 = scmp.ne.s32.totalorder %s127_s15, %s453_s16  ;;  %p457_p12 = scmp.lt.u32.totalorder %s598_s8, %s453_s16 }
  0x96   :  { %p459_p0 = scmp.lt.u32.totalorder %s453_s16, %s127_s15 }
  0x97   :  { %p458_p13 = por %p457_p12, %p456_p10 }
  0x99   :  { %p460_p1 = por %p459_p0, %p458_p13 }
  0x9b   :  { %p461_p2 = pnand %p460_p1, %p454_p9 }
  0x9d   :  { %464 = shalt.err (!%p461_p2)  }
  0x9e   :  { %s465_s17 = scalar_lea.vmem %s675_s27, 16  ;;  %p470_p4 = scmp.lt.s32.totalorder %s675_s27, %s581_s21 }
  0x9f   :  { %p466_p3 = scmp.ne.s32.totalorder %s675_s27, %s465_s17  ;;  %p471_p5 = scmp.lt.s32.totalorder %s607_s12, %s465_s17 }
  0xa1   :  { %p472_p6 = por %p471_p5, %p470_p4 }
  0xa3   :  { %p473_p7 = pnand %p472_p6, %p466_p3 }
  0xa5   :  { %476 = shalt.err (!%p473_p7)  }
  0xa6   :  { %140 = dma.hbm_to_vmem [thread:$0]  %s127_s15, 16, %s675_s27, [#allocation2 + $0x6] }
  0xa7   :  { %s551_s18 = smov [#allocation5 + $0x7]   ;;  %s281_s23 = sshll.u32 %s273_s0, 4 }
  0xa8   :  { %s153_s22 = sshll.u32 %s551_s18, 4  ;;  %s143_s28 = scalar_lea.hbm %s731_s1, %s281_s23  ;;  %s154_s22 = int_to_ptr.vmem [resolvable:$true] %s153_s22 }
  0xa9   :  { %s477_s29 = scalar_lea.hbm %s143_s28, 16  ;;  %p480_p9 = scmp.lt.u32.totalorder %s143_s28, %s731_s1 }
  0xaa   :  { %p478_p8 = scmp.ne.s32.totalorder %s143_s28, %s477_s29  ;;  %p481_p10 = scmp.lt.u32.totalorder %s598_s8, %s477_s29 }
  0xab   :  { %p483_p13 = scmp.lt.u32.totalorder %s477_s29, %s143_s28 }
  0xac   :  { %p482_p12 = por %p481_p10, %p480_p9 }
  0xae   :  { %p484_p0 = por %p483_p13, %p482_p12 }
  0xb0   :  { %p485_p1 = pnand %p484_p0, %p478_p8 }
  0xb2   :  { %488 = shalt.err (!%p485_p1)  }
  0xb3   :  { %s489_s27 = scalar_lea.vmem %s154_s22, 16  ;;  %p494_p3 = scmp.lt.s32.totalorder %s154_s22, %s581_s21 }
  0xb4   :  { %p490_p2 = scmp.ne.s32.totalorder %s154_s22, %s489_s27  ;;  %p495_p4 = scmp.lt.s32.totalorder %s607_s12, %s489_s27 }
  0xb6   :  { %p496_p5 = por %p495_p4, %p494_p3 }
  0xb8   :  { %p497_p6 = pnand %p496_p5, %p490_p2 }
  0xba   :  { %500 = shalt.err (!%p497_p6)  }
  0xbb   :  { %156 = dma.hbm_to_vmem [thread:$0]  %s143_s28, 16, %s154_s22, [#allocation2 + $0x7] }
  0xbc   :  { %525 = dma.done.wait [#allocation2], 16 }
  0xbd   :  { %526 = vsyncadd [#allocation2], 4294967280 }
  0xbe   :  { %527 = dma.done.wait [#allocation2 + $0x1], 16 }
  0xbf   :  { %528 = vsyncadd [#allocation2 + $0x1], 4294967280 }
  0xc0   :  { %529 = dma.done.wait [#allocation2 + $0x2], 16 }
  0xc1   :  { %530 = vsyncadd [#allocation2 + $0x2], 4294967280 }
  0xc2   :  { %531 = dma.done.wait [#allocation2 + $0x3], 16 }
  0xc3   :  { %532 = vsyncadd [#allocation2 + $0x3], 4294967280 }
  0xc4   :  { %533 = dma.done.wait [#allocation2 + $0x4], 16 }
  0xc5   :  { %534 = vsyncadd [#allocation2 + $0x4], 4294967280 }
  0xc6   :  { %535 = dma.done.wait [#allocation2 + $0x5], 16 }
  0xc7   :  { %536 = vsyncadd [#allocation2 + $0x5], 4294967280 }
  0xc8   :  { %537 = dma.done.wait [#allocation2 + $0x6], 16 }
  0xc9   :  { %538 = vsyncadd [#allocation2 + $0x6], 4294967280 }
  0xca   :  { %539 = dma.done.wait [#allocation2 + $0x7], 16 }
  0xcb   :  { %540 = vsyncadd [#allocation2 + $0x7], 4294967280  ;;  %p502_p7 = scmp.ne.s32.totalorder %s581_s21, %s607_s12  ;;  %p507_p8 = scmp.lt.s32.totalorder %s607_s12, %s607_s12 }
  0xcd   :  { %p508_p9 = por %p507_p8, %p326_p11 }
  0xcf   :  { %p509_p10 = pnand %p508_p9, %p502_p7 }
  0xd1   :  { %512 = shalt.err (!%p509_p10)
}
  0xd2   :  { %s513_s3 = scalar_lea.hbm %s732_s2, 128 }
  0xd3   :  { %p514_p12 = scmp.ne.s32.totalorder %s732_s2, %s513_s3  ;;  %p517_p13 = scmp.lt.u32.totalorder %s513_s3, %s732_s2 }
  0xd5   :  { %p519_p0 = pnand %p517_p13, %p514_p12 }
  0xd7   :  { %522 = shalt.err (!%p519_p0)
}
  0xd8   :  { %183 = dma.vmem_to_hbm [thread:$0]  %s581_s21, 128, %s732_s2, [#allocation6]  }
  0xd9   :  { %541 = dma.done.wait [#allocation6], 128  }
  0xda   :  { %542 = vsyncadd [#allocation6], 4294967168 }
  0xdb   :  { %187 = vsyncpa [#allocation6], 1 }
  0xdc   :  { %188 = vsyncmov [#allocation2] }
  0xdf   :  { %s189_s10 = vpop.sfrf %188 }
  0xe0   :  { %p282_p11 = scmp.ne.s32.totalorder %s189_s10, 0 }
  0xe2   :  { %193 = shalt.err (%p282_p11)  }
  0xe3   :  { %195 = vsyncmov [#allocation2 + $0x1] }
  0xe6   :  { %s196_s11 = vpop.sfrf %195 }
  0xe7   :  { %p283_p1 = scmp.ne.s32.totalorder %s196_s11, 0 }
  0xe9   :  { %200 = shalt.err (%p283_p1)  }
  0xea   :  { %202 = vsyncmov [#allocation2 + $0x2] }
  0xed   :  { %s203_s0 = vpop.sfrf %202 }
  0xee   :  { %p284_p2 = scmp.ne.s32.totalorder %s203_s0, 0 }
  0xf0   :  { %207 = shalt.err (%p284_p2)  }
  0xf1   :  { %209 = vsyncmov [#allocation2 + $0x3] }
  0xf4   :  { %s210_s13 = vpop.sfrf %209 }
  0xf5   :  { %p285_p3 = scmp.ne.s32.totalorder %s210_s13, 0 }
  0xf7   :  { %214 = shalt.err (%p285_p3)  }
  0xf8   :  { %216 = vsyncmov [#allocation2 + $0x4] }
  0xfb   :  { %s217_s2 = vpop.sfrf %216 }
  0xfc   :  { %p286_p4 = scmp.ne.s32.totalorder %s217_s2, 0 }
  0xfe   :  { %221 = shalt.err (%p286_p4)  }
  0xff   :  { %223 = vsyncmov [#allocation2 + $0x5] }
 0x102   :  { %s224_s21 = vpop.sfrf %223 }
 0x103   :  { %p287_p5 = scmp.ne.s32.totalorder %s224_s21, 0 }
 0x105   :  { %228 = shalt.err (%p287_p5)  }
 0x106   :  { %230 = vsyncmov [#allocation2 + $0x6] }
 0x109   :  { %s231_s14 = vpop.sfrf %230 }
 0x10a   :  { %p288_p6 = scmp.ne.s32.totalorder %s231_s14, 0 }
 0x10c   :  { %235 = shalt.err (%p288_p6)  }
 0x10d   :  { %237 = vsyncmov [#allocation2 + $0x7] }
 0x110   :  { %s238_s15 = vpop.sfrf %237 }
 0x111   :  { %p289_p7 = scmp.ne.s32.totalorder %s238_s15, 0 }
 0x113   :  { %242 = shalt.err (%p289_p7)  }

</bundles_post_ra>
